<compile_context>
chip_gen: v7x
topology: tpu7x:2x2x1
jax: 0.10.0
libtpu: 0.0.40
codegen_flags: <defaults>
</compile_context>

<pallas_src>
import functools

import jax
import jax.numpy as jnp
from jax import lax
from jax.experimental import pallas as pl
from jax.experimental.pallas import tpu as pltpu


# ---------------------------------------------------------------------------
# Small helpers
# ---------------------------------------------------------------------------
def _vmem_capacity_bytes():
    """Per-core VMEM capacity; conservative 64 MiB (v7x) fallback."""
    try:
        info = pltpu.get_tpu_info()
        for attr in ("vmem_capacity_bytes", "vmem_bytes", "vmem_size_bytes"):
            v = getattr(info, attr, None)
            if v:
                return int(v)
    except Exception:
        pass
    return 64 << 20


def _vmem_limit(need_bytes, cap):
    """Scoped-VMEM limit: needed working set with headroom, below physical."""
    return int(min(max(need_bytes * 5 // 4 + (4 << 20), 16 << 20), cap * 7 // 8))


def _legal_tile(t, hw):
    """Largest legal lane tile <= t: either the full extent or a multiple of 128."""
    t = int(min(t, hw))
    if t >= hw:
        return hw
    t = max((t // 128) * 128, 128)
    return hw if t > hw else t


def _mac_unrolled(wf, x):
    """Unrolled VPU multiply-accumulate for tiny C: (C_out, C) @ (C, HW)."""
    y = wf[:, 0:1] * x[0:1, :]
    for c in range(1, x.shape[0]):
        y = y + wf[:, c:c + 1] * x[c:c + 1, :]
    return y


# ---------------------------------------------------------------------------
# Fused single-pass kernel: whole sample resident in VMEM. grid=(N,)
# ---------------------------------------------------------------------------
def _fused_kernel(x_ref, gamma_ref, beta_ref, w_ref, b_ref, o_ref, *,
                  eps, inv_count, compute_dtype, use_vpu_mac):
    x = x_ref[0].astype(jnp.float32)                          # (C, HW)
    s = jnp.sum(x)
    sq = jnp.sum(x * x)
    mean = s * inv_count
    var = jnp.maximum(sq * inv_count - mean * mean, 0.0)      # cancellation clamp
    inv = lax.rsqrt(var + eps)
    a = gamma_ref[...] * inv                                  # (1, C)
    c = beta_ref[...] - mean * a                              # (1, C)
    w = w_ref[...]                                            # (C_out, C) f32
    wf = w * a
    bf = jnp.sum(w * c, axis=1, keepdims=True) + b_ref[...]   # (C_out, 1)
    if use_vpu_mac:
        y = _mac_unrolled(wf, x)                              # tiny-C VPU path (f32)
    else:
        y = jnp.dot(wf.astype(compute_dtype), x.astype(compute_dtype),
                    preferred_element_type=jnp.float32)
    o_ref[0] = (y + bf).astype(o_ref.dtype)


# ---------------------------------------------------------------------------
# Two-pass fallback, Pass 1: per-sample stats -> fold vectors a, c.
# grid=(N, HW_tiles). Vector VMEM accumulators; one cross-lane reduce at end.
# ---------------------------------------------------------------------------
def _stats_kernel(x_ref, gamma_ref, beta_ref, a_ref, c_ref,
                  sum_acc, sq_acc, *, eps, inv_count, hw, tile_hw):
    t = pl.program_id(1)

    @pl.when(t == 0)
    def _init():
        sum_acc[...] = jnp.zeros_like(sum_acc)
        sq_acc[...] = jnp.zeros_like(sq_acc)

    x = x_ref[0].astype(jnp.float32)                          # (C, tile_hw)
    if hw % tile_hw != 0:
        # Mask out-of-range lanes of the ragged last tile (no host padding).
        lane = lax.broadcasted_iota(jnp.int32, x.shape, 1) + t * tile_hw
        x = jnp.where(lane < hw, x, 0.0)
    sum_acc[...] += x                                          # pure VPU per step
    sq_acc[...] += x * x

    @pl.when(t == pl.num_programs(1) - 1)
    def _finalize():
        s = jnp.sum(sum_acc[...])                              # single XLU reduce
        sq = jnp.sum(sq_acc[...])
        mean = s * inv_count
        var = jnp.maximum(sq * inv_count - mean * mean, 0.0)
        inv = lax.rsqrt(var + eps)
        a = gamma_ref[...] * inv                               # (1, C)
        a_ref[0] = a
        c_ref[0] = beta_ref[...] - mean * a


# ---------------------------------------------------------------------------
# Two-pass fallback, Pass 2: fold Wf/bf once per sample (t==0), apply tiled.
# grid=(N, HW_tiles).
# ---------------------------------------------------------------------------
def _apply_kernel(x_ref, a_ref, c_ref, w_ref, b_ref, o_ref, wf_ref, bf_ref, *,
                  compute_dtype, use_vpu_mac):
    t = pl.program_id(1)

    @pl.when(t == 0)
    def _fold():
        w = w_ref[...]                                         # (C_out, C) f32, resident
        wf_ref[...] = (w * a_ref[0]).astype(wf_ref.dtype)      # cast once per sample
        bf_ref[...] = jnp.sum(w * c_ref[0], axis=1, keepdims=True) + b_ref[...]

    if use_vpu_mac:
        y = _mac_unrolled(wf_ref[...], x_ref[0].astype(jnp.float32))
    else:
        y = jnp.dot(wf_ref[...], x_ref[0].astype(compute_dtype),
                    preferred_element_type=jnp.float32)
    o_ref[0] = (y + bf_ref[...]).astype(o_ref.dtype)


# ---------------------------------------------------------------------------
# Wrapper
# ---------------------------------------------------------------------------
def prenorm_pallas(x, gamma, beta, conv_w, conv_b, *, eps=1e-5,
                   compute_dtype=jnp.bfloat16, use_vpu_mac=None,
                   force_two_pass=False, stats_tile=None, apply_tile=None):
    """PreNorm: GroupNorm(1, C) -> 1x1 Conv2d, fused as Pallas TPU kernels.

    x: (N, C, H, W). gamma/beta: (C,). conv_w: (C_out, C) [or (C_out, C, 1, 1)].
    conv_b: (C_out,).
    """
    N, C, H, W = x.shape
    C_out = conv_w.shape[0]
    HW = H * W

    x_isz = jnp.dtype(x.dtype).itemsize
    out_isz = x_isz
    if use_vpu_mac is None:
        use_vpu_mac = (C <= 8 and C_out <= 8)

    # Free metadata reshapes (no HBM copies).
    x3 = x.reshape(N, C, HW)
    gamma_r = gamma.reshape(1, C).astype(jnp.float32)
    beta_r = beta.reshape(1, C).astype(jnp.float32)
    w2 = conv_w.reshape(C_out, C).astype(jnp.float32)
    b2 = conv_b.reshape(C_out, 1).astype(jnp.float32)

    inv_count = 1.0 / float(C * HW)
    cap = _vmem_capacity_bytes()
    param_bytes = (C_out * C + C_out + 2 * C) * 4

    # ---- fused single-pass when one sample is VMEM-resident -----------------
    resident_budget = (22 << 20) if cap <= (64 << 20) else (44 << 20)
    need_fused = (2 * HW * (C * x_isz + C_out * out_isz)       # double-buffered blocks
                  + 2 * param_bytes
                  + (2 * C + 2 * C_out) * HW * 4)              # in-body f32 temps
    if (not force_two_pass) and need_fused + (4 << 20) <= resident_budget:
        out = pl.pallas_call(
            functools.partial(_fused_kernel, eps=float(eps), inv_count=inv_count,
                              compute_dtype=compute_dtype, use_vpu_mac=use_vpu_mac),
            out_shape=jax.ShapeDtypeStruct((N, C_out, HW), x.dtype),
            grid_spec=pltpu.PrefetchScalarGridSpec(
                num_scalar_prefetch=0,
                grid=(N,),
                in_specs=[
                    pl.BlockSpec((1, C, HW), lambda n: (n, 0, 0)),      # x (whole sample)
                    pl.BlockSpec((1, C), lambda n: (0, 0)),             # gamma
                    pl.BlockSpec((1, C), lambda n: (0, 0)),             # beta
                    pl.BlockSpec((C_out, C), lambda n: (0, 0)),         # W
                    pl.BlockSpec((C_out, 1), lambda n: (0, 0)),         # b
                ],
                out_specs=pl.BlockSpec((1, C_out, HW), lambda n: (n, 0, 0)),
            ),
            compiler_params=pltpu.CompilerParams(
                dimension_semantics=("parallel",),
                vmem_limit_bytes=_vmem_limit(need_fused, cap),
            ),
        )(x3, gamma_r, beta_r, w2, b2)
        return out.reshape(N, C_out, H, W)

    # ---- two-pass tiled fallback ---------------------------------------------
    # Per-pass working-set budget derived from this chip's VMEM.
    work_budget = int(min(max(cap // 4, 8 << 20), 32 << 20))

    # Pass 1: per-sample stats -> (a, c). Bigger tile (no output, no W).
    per_lane1 = C * (2 * x_isz + 3 * 4)    # double-buffered x + 2 f32 accs + f32 temp
    if stats_tile is None:
        stats_tile = min(work_budget // max(per_lane1, 1), 16384)
    tile1 = _legal_tile(stats_tile, HW)
    n_t1 = pl.cdiv(HW, tile1)
    need1 = per_lane1 * tile1 + param_bytes

    a_vec, c_vec = pl.pallas_call(
        functools.partial(_stats_kernel, eps=float(eps), inv_count=inv_count,
                          hw=HW, tile_hw=tile1),
        out_shape=(jax.ShapeDtypeStruct((N, 1, C), jnp.float32),
                   jax.ShapeDtypeStruct((N, 1, C), jnp.float32)),
        grid_spec=pltpu.PrefetchScalarGridSpec(
            num_scalar_prefetch=0,
            grid=(N, n_t1),
            in_specs=[
                pl.BlockSpec((1, C, tile1), lambda n, t: (n, 0, t)),    # x
                pl.BlockSpec((1, C), lambda n, t: (0, 0)),              # gamma
                pl.BlockSpec((1, C), lambda n, t: (0, 0)),              # beta
            ],
            out_specs=[
                pl.BlockSpec((1, 1, C), lambda n, t: (n, 0, 0)),        # a = gamma*inv
                pl.BlockSpec((1, 1, C), lambda n, t: (n, 0, 0)),        # c = beta-mean*a
            ],
            scratch_shapes=[pltpu.VMEM((C, tile1), jnp.float32),        # sum acc
                            pltpu.VMEM((C, tile1), jnp.float32)],       # sumsq acc
        ),
        compiler_params=pltpu.CompilerParams(
            dimension_semantics=("parallel", "arbitrary"),
            vmem_limit_bytes=_vmem_limit(need1, cap),
        ),
    )(x3, gamma_r, beta_r)

    # Pass 2: fold once per sample into VMEM scratch, then y = Wf @ x + bf.
    wf_dtype = jnp.float32 if use_vpu_mac else compute_dtype
    wf_isz = jnp.dtype(wf_dtype).itemsize
    fixed2 = C_out * C * (4 + wf_isz) + (2 * C + 2 * C_out) * 4
    per_lane2 = 2 * (C * x_isz + C_out * out_isz) + (C + C_out) * 4
    if apply_tile is None:
        apply_tile = max((work_budget - fixed2) // max(per_lane2, 1), 128)
        apply_tile = min(apply_tile, 8192)
    tile2 = _legal_tile(apply_tile, HW)
    n_t2 = pl.cdiv(HW, tile2)
    need2 = per_lane2 * tile2 + fixed2

    out = pl.pallas_call(
        functools.partial(_apply_kernel, compute_dtype=compute_dtype,
                          use_vpu_mac=use_vpu_mac),
        out_shape=jax.ShapeDtypeStruct((N, C_out, HW), x.dtype),
        grid_spec=pltpu.PrefetchScalarGridSpec(
            num_scalar_prefetch=0,
            grid=(N, n_t2),
            in_specs=[
                pl.BlockSpec((1, C, tile2), lambda n, t: (n, 0, t)),    # x
                pl.BlockSpec((1, 1, C), lambda n, t: (n, 0, 0)),        # a (per sample)
                pl.BlockSpec((1, 1, C), lambda n, t: (n, 0, 0)),        # c (per sample)
                pl.BlockSpec((C_out, C), lambda n, t: (0, 0)),          # W (resident)
                pl.BlockSpec((C_out, 1), lambda n, t: (0, 0)),          # b (resident)
            ],
            out_specs=pl.BlockSpec((1, C_out, tile2), lambda n, t: (n, 0, t)),
            scratch_shapes=[
                pltpu.VMEM((C_out, C), wf_dtype),                       # folded weight
                pltpu.VMEM((C_out, 1), jnp.float32),                    # folded bias
            ],
        ),
        compiler_params=pltpu.CompilerParams(
            dimension_semantics=("parallel", "arbitrary"),
            vmem_limit_bytes=_vmem_limit(need2, cap),
        ),
    )(x3, a_vec, c_vec, w2, b2)
    return out.reshape(N, C_out, H, W)


# ---------------------------------------------------------------------------
# Pure-JAX reference (PyTorch GroupNorm(1, C) -> 1x1 Conv2d)
# ---------------------------------------------------------------------------
def prenorm_ref(x, gamma, beta, conv_w, conv_b, *, eps=1e-5):
    xf = x.astype(jnp.float32)
    mean = xf.mean(axis=(1, 2, 3), keepdims=True)
    var = ((xf - mean) ** 2).mean(axis=(1, 2, 3), keepdims=True)
    xn = (xf - mean) / jnp.sqrt(var + eps)
    xn = xn * gamma[None, :, None, None] + beta[None, :, None, None]
    y = jnp.einsum("oc,nchw->nohw", conv_w.reshape(conv_w.shape[0], -1), xn)
    y = y + conv_b[None, :, None, None]
    return y.astype(x.dtype)


if __name__ == "__main__":
    key = jax.random.PRNGKey(0)
    kx, kg, kb, kw, kc = jax.random.split(key, 5)

    N, C, H, W = 2, 4, 16, 16                 # dim = C = 4
    x = jax.random.normal(kx, (N, C, H, W), dtype=jnp.float32)
    gamma = 1.0 + 0.1 * jax.random.normal(kg, (C,), dtype=jnp.float32)
    beta = 0.1 * jax.random.normal(kb, (C,), dtype=jnp.float32)
    conv_w = jax.random.normal(kw, (C, C), dtype=jnp.float32) / jnp.sqrt(C)
    conv_b = 0.1 * jax.random.normal(kc, (C,), dtype=jnp.float32)

    ref = prenorm_ref(x, gamma, beta, conv_w, conv_b)

    # 1) Fused single-pass, f32 compute (tiny-C VPU path): strict check.
    out = jax.block_until_ready(
        prenorm_pallas(x, gamma, beta, conv_w, conv_b, compute_dtype=jnp.float32))
    assert out.shape == (N, C, H, W)
    assert jnp.allclose(out, ref, atol=1e-4, rtol=1e-4), "fused f32 path mismatch"

    # 2) Fused single-pass, default settings.
    out = jax.block_until_ready(prenorm_pallas(x, gamma, beta, conv_w, conv_b))
    assert jnp.allclose(out, ref, atol=5e-2, rtol=5e-2), "fused default path mismatch"

    # 3) Fused single-pass, forced MXU (bf16) path.
    out = jax.block_until_ready(
        prenorm_pallas(x, gamma, beta, conv_w, conv_b, use_vpu_mac=False))
    assert jnp.allclose(out, ref, atol=5e-2, rtol=5e-2), "fused bf16 MXU path mismatch"

    # 4a) Two-pass tiled path with a ragged last HW tile (HW=144, tile=128).
    H2 = W2 = 12
    x2 = jax.random.normal(kx, (N, C, H2, W2), dtype=jnp.float32)
    ref2 = prenorm_ref(x2, gamma, beta, conv_w, conv_b)
    out2 = jax.block_until_ready(prenorm_pallas(
        x2, gamma, beta, conv_w, conv_b, compute_dtype=jnp.float32,
        force_two_pass=True, stats_tile=128, apply_tile=128))
    assert out2.shape == (N, C, H2, W2)
    assert jnp.allclose(out2, ref2, atol=1e-4, rtol=1e-4), "two-pass ragged mismatch"

    # 4b) Two-pass tiled path, bf16 MXU apply with per-sample folded-W scratch.
    out3 = jax.block_until_ready(prenorm_pallas(
        x, gamma, beta, conv_w, conv_b, use_vpu_mac=False,
        force_two_pass=True, stats_tile=128, apply_tile=128))
    assert jnp.allclose(out3, ref, atol=5e-2, rtol=5e-2), "two-pass bf16 mismatch"

    print("KERNEL_OK")
</pallas_src>

<mosaic_0001>
module attributes {stable_mosaic.version = 11 : i64} {
  func.func @_fused_kernel(%arg0: i32, %arg1: memref<1x4x256xf32, #tpu.memory_space<vmem>>, %arg2: memref<1x4xf32, #tpu.memory_space<vmem>>, %arg3: memref<1x4xf32, #tpu.memory_space<vmem>>, %arg4: memref<4x4xf32, #tpu.memory_space<vmem>>, %arg5: memref<4x1xf32, #tpu.memory_space<vmem>>, %arg6: memref<1x4x256xf32, #tpu.memory_space<vmem>>) attributes {dimension_semantics = [#tpu.dimension_semantics<parallel>], iteration_bounds = array<i64: 2>, scalar_prefetch = 0 : i64, scratch_operands = 0 : i64, tpu.core_type = #tpu.core_type<tc>, window_params = [{transform_indices = @transform_0, window_bounds = array<i64: 1, 4, 256>}, {pipeline_mode = #tpu.pipeline_mode<synchronous>, transform_indices = @transform_1, window_bounds = array<i64: 1, 4>}, {pipeline_mode = #tpu.pipeline_mode<synchronous>, transform_indices = @transform_2, window_bounds = array<i64: 1, 4>}, {pipeline_mode = #tpu.pipeline_mode<synchronous>, transform_indices = @transform_3, window_bounds = array<i64: 4, 4>}, {pipeline_mode = #tpu.pipeline_mode<synchronous>, transform_indices = @transform_4, window_bounds = array<i64: 4, 1>}, {transform_indices = @transform_5, window_bounds = array<i64: 1, 4, 256>}]} {
    %c0 = arith.constant 0 : index
    %c0_0 = arith.constant 0 : index
    %c0_1 = arith.constant 0 : index
    %0 = vector.load %arg1[%c0, %c0_0, %c0_1] : memref<1x4x256xf32, #tpu.memory_space<vmem>>, vector<1x4x256xf32>
    %1 = vector.shape_cast %0 : vector<1x4x256xf32> to vector<4x256xf32>
    %2 = vector.shape_cast %1 : vector<4x256xf32> to vector<1x4x256xf32>
    %cst = arith.constant dense<0.000000e+00> : vector<1xf32>
    %3 = vector.multi_reduction <add>, %2, %cst [1, 2] : vector<1x4x256xf32> to vector<1xf32>
    %4 = vector.shape_cast %3 : vector<1xf32> to vector<1x1x1xf32>
    %5 = vector.extract %4[0, 0, 0] : f32 from vector<1x1x1xf32>
    %6 = arith.mulf %1, %1 : vector<4x256xf32>
    %7 = vector.shape_cast %6 : vector<4x256xf32> to vector<1x4x256xf32>
    %cst_2 = arith.constant dense<0.000000e+00> : vector<1xf32>
    %8 = vector.multi_reduction <add>, %7, %cst_2 [1, 2] : vector<1x4x256xf32> to vector<1xf32>
    %9 = vector.shape_cast %8 : vector<1xf32> to vector<1x1x1xf32>
    %10 = vector.extract %9[0, 0, 0] : f32 from vector<1x1x1xf32>
    %cst_3 = arith.constant 9.765625E-4 : f32
    %11 = arith.mulf %5, %cst_3 : f32
    %cst_4 = arith.constant 9.765625E-4 : f32
    %12 = arith.mulf %10, %cst_4 : f32
    %13 = arith.mulf %11, %11 : f32
    %14 = arith.subf %12, %13 : f32
    %cst_5 = arith.constant 0.000000e+00 : f32
    %15 = arith.maximumf %14, %cst_5 : f32
    %cst_6 = arith.constant 9.99999974E-6 : f32
    %16 = arith.addf %15, %cst_6 : f32
    %17 = math.rsqrt %16 : f32
    %c0_7 = arith.constant 0 : index
    %c0_8 = arith.constant 0 : index
    %18 = vector.load %arg2[%c0_7, %c0_8] : memref<1x4xf32, #tpu.memory_space<vmem>>, vector<1x4xf32>
    %19 = vector.broadcast %17 : f32 to vector<1x4xf32>
    %20 = arith.mulf %18, %19 : vector<1x4xf32>
    %c0_9 = arith.constant 0 : index
    %c0_10 = arith.constant 0 : index
    %21 = vector.load %arg3[%c0_9, %c0_10] : memref<1x4xf32, #tpu.memory_space<vmem>>, vector<1x4xf32>
    %22 = vector.broadcast %11 : f32 to vector<1x4xf32>
    %23 = arith.mulf %22, %20 : vector<1x4xf32>
    %24 = arith.subf %21, %23 : vector<1x4xf32>
    %c0_11 = arith.constant 0 : index
    %c0_12 = arith.constant 0 : index
    %25 = vector.load %arg4[%c0_11, %c0_12] : memref<4x4xf32, #tpu.memory_space<vmem>>, vector<4x4xf32>
    %26 = vector.broadcast %20 : vector<1x4xf32> to vector<4x4xf32>
    %27 = arith.mulf %25, %26 : vector<4x4xf32>
    %28 = vector.broadcast %24 : vector<1x4xf32> to vector<4x4xf32>
    %29 = arith.mulf %25, %28 : vector<4x4xf32>
    %cst_13 = arith.constant dense<0.000000e+00> : vector<4xf32>
    %30 = vector.multi_reduction <add>, %29, %cst_13 [1] : vector<4x4xf32> to vector<4xf32>
    %31 = vector.shape_cast %30 : vector<4xf32> to vector<4x1xf32>
    %c0_14 = arith.constant 0 : index
    %c0_15 = arith.constant 0 : index
    %32 = vector.load %arg5[%c0_14, %c0_15] : memref<4x1xf32, #tpu.memory_space<vmem>>, vector<4x1xf32>
    %33 = arith.addf %31, %32 : vector<4x1xf32>
    %34 = vector.extract_strided_slice %27 {offsets = [0, 0], sizes = [4, 1], strides = [1, 1]} : vector<4x4xf32> to vector<4x1xf32>
    %35 = vector.extract_strided_slice %1 {offsets = [0, 0], sizes = [1, 256], strides = [1, 1]} : vector<4x256xf32> to vector<1x256xf32>
    %36 = vector.broadcast %34 : vector<4x1xf32> to vector<4x256xf32>
    %37 = vector.broadcast %35 : vector<1x256xf32> to vector<4x256xf32>
    %38 = arith.mulf %36, %37 : vector<4x256xf32>
    %39 = vector.extract_strided_slice %27 {offsets = [0, 1], sizes = [4, 1], strides = [1, 1]} : vector<4x4xf32> to vector<4x1xf32>
    %40 = vector.extract_strided_slice %1 {offsets = [1, 0], sizes = [1, 256], strides = [1, 1]} : vector<4x256xf32> to vector<1x256xf32>
    %41 = vector.broadcast %39 : vector<4x1xf32> to vector<4x256xf32>
    %42 = vector.broadcast %40 : vector<1x256xf32> to vector<4x256xf32>
    %43 = arith.mulf %41, %42 : vector<4x256xf32>
    %44 = arith.addf %38, %43 : vector<4x256xf32>
    %45 = vector.extract_strided_slice %27 {offsets = [0, 2], sizes = [4, 1], strides = [1, 1]} : vector<4x4xf32> to vector<4x1xf32>
    %46 = vector.extract_strided_slice %1 {offsets = [2, 0], sizes = [1, 256], strides = [1, 1]} : vector<4x256xf32> to vector<1x256xf32>
    %47 = vector.broadcast %45 : vector<4x1xf32> to vector<4x256xf32>
    %48 = vector.broadcast %46 : vector<1x256xf32> to vector<4x256xf32>
    %49 = arith.mulf %47, %48 : vector<4x256xf32>
    %50 = arith.addf %44, %49 : vector<4x256xf32>
    %51 = vector.extract_strided_slice %27 {offsets = [0, 3], sizes = [4, 1], strides = [1, 1]} : vector<4x4xf32> to vector<4x1xf32>
    %52 = vector.extract_strided_slice %1 {offsets = [3, 0], sizes = [1, 256], strides = [1, 1]} : vector<4x256xf32> to vector<1x256xf32>
    %53 = vector.broadcast %51 : vector<4x1xf32> to vector<4x256xf32>
    %54 = vector.broadcast %52 : vector<1x256xf32> to vector<4x256xf32>
    %55 = arith.mulf %53, %54 : vector<4x256xf32>
    %56 = arith.addf %50, %55 : vector<4x256xf32>
    %57 = vector.broadcast %33 : vector<4x1xf32> to vector<4x256xf32>
    %58 = arith.addf %56, %57 : vector<4x256xf32>
    %c0_16 = arith.constant 0 : index
    %c0_17 = arith.constant 0 : index
    %c0_18 = arith.constant 0 : index
    %59 = vector.load %arg6[%c0_16, %c0_17, %c0_18] : memref<1x4x256xf32, #tpu.memory_space<vmem>>, vector<1x4x256xf32>
    %60 = vector.shape_cast %59 : vector<1x4x256xf32> to vector<4x256xf32>
    %61 = vector.shape_cast %58 : vector<4x256xf32> to vector<1x4x256xf32>
    tpu.vector_store %arg6[%c0_16, %c0_17, %c0_18], %61 {strides = array<i32>} : memref<1x4x256xf32, #tpu.memory_space<vmem>>, vector<1x4x256xf32>,
    return
  }
  func.func @transform_0(%arg0: i32) -> (i32, i32, i32) {
    %c0_i32 = arith.constant 0 : i32
    %c0_i32_0 = arith.constant 0 : i32
    %c0_i32_1 = arith.constant 0 : i32
    return %arg0, %c0_i32, %c0_i32_0 : i32, i32, i32
  }
  func.func @transform_1(%arg0: i32) -> (i32, i32) {
    %c0_i32 = arith.constant 0 : i32
    %c0_i32_0 = arith.constant 0 : i32
    %c0_i32_1 = arith.constant 0 : i32
    return %c0_i32, %c0_i32_0 : i32, i32
  }
  func.func @transform_2(%arg0: i32) -> (i32, i32) {
    %c0_i32 = arith.constant 0 : i32
    %c0_i32_0 = arith.constant 0 : i32
    %c0_i32_1 = arith.constant 0 : i32
    return %c0_i32, %c0_i32_0 : i32, i32
  }
  func.func @transform_3(%arg0: i32) -> (i32, i32) {
    %c0_i32 = arith.constant 0 : i32
    %c0_i32_0 = arith.constant 0 : i32
    %c0_i32_1 = arith.constant 0 : i32
    return %c0_i32, %c0_i32_0 : i32, i32
  }
  func.func @transform_4(%arg0: i32) -> (i32, i32) {
    %c0_i32 = arith.constant 0 : i32
    %c0_i32_0 = arith.constant 0 : i32
    %c0_i32_1 = arith.constant 0 : i32
    return %c0_i32, %c0_i32_0 : i32, i32
  }
  func.func @transform_5(%arg0: i32) -> (i32, i32, i32) {
    %c0_i32 = arith.constant 0 : i32
    %c0_i32_0 = arith.constant 0 : i32
    %c0_i32_1 = arith.constant 0 : i32
    return %arg0, %c0_i32, %c0_i32_0 : i32, i32, i32
  }
}

</mosaic_0001>

<bundles_post_ra>
// kernel: tpu_custom_call.1
= control target key start
LH: loop header
LB: loop body
LE: loop exit
PB: predicated region body
PF: predicated region fallthrough
CT: control target
= control target key end

     0   :  { %10 = vsyncpa [#allocation3], 0  ;;  %s920_s0 = inlined_call_operand.hbm [shape: f32[2,4,256], index: 0, kind: input, shape index: {}]   ;;  %s921_s1 = inlined_call_operand.vmem [shape: f32[1,4], index: 1, kind: input, shape index: {}]   ;;  %s922_s2 = inlined_call_operand.vmem [shape: f32[1,4], index: 2, kind: input, shape index: {}]   ;;  %s923_s3 = inlined_call_operand.vmem [shape: f32[4,4], index: 3, kind: input, shape index: {}]   ;;  %s924_s4 = inlined_call_operand.vmem [shape: f32[4,1], index: 4, kind: input, shape index: {}]   ;;  %s925_s5 = inlined_call_operand.hbm [shape: f32[2,4,256], index: 5, kind: output, shape index: {}]  }
   0x1   :  { %12 = vsyncpa [#allocation3 + $0x1], 0 }
   0x2   :  { %13 = vsyncpa [#allocation4], 0 }
   0x3   :  { %15 = vsyncpa [#allocation4 + $0x1], 0  ;;  %s728_s18 = smov 0   ;;  %s730_s19 = smov 0  }
   0x4   :  { %s732_s20 = smov 0   ;;  %s734_s21 = smov 0  }
   0x5 LB: > { %s749_s22 = sadd.s32 4294967295, %s689_s21   ;;  %s511_s23 = sadd.s32 4294967294, %s689_s21   ;;  %s689_s21 = sphi %s734_s21, %s940_s21   ;;  %s685_s20 = sphi %s732_s20, %s939_s20   ;;  %s681_s19 = sphi %s730_s19, %s938_s19   ;;  %s677_s18 = sphi %s728_s18, %s937_s18  }
   0x6   : > { %s753_s24 = sadd.s32 1, %s689_s21   ;;  %s28_s25 = sadd.s32 1, %s685_s20 }
   0x7   : > { %s25_s26 = ssub.s32 %s689_s21, %s753_s24  ;;  %p35_p0 = scmp.ne.s32.totalorder %s685_s20, %s681_s19 }
   0x8   : > { %p26_p1 = scmp.eq.s32.totalorder %s25_s26, 0  ;;  %p36_p2 = scmp.eq.s32.totalorder %s689_s21, 0 }
   0x9   : > { %p41_p3 = scmp.ne.s32.totalorder %s681_s19, %s677_s18  ;;  %p42_p4 = scmp.eq.s32.totalorder %s749_s22, 0 }
   0xa   : > { %s765_s27 = scalar_select %p26_p1, %s685_s20, %s28_s25  }
   0xb   : > { %p767_p5 = por %p36_p2, %p35_p0  ;;  %p771_p6 = por %p42_p4, %p41_p3 }
   0xc   : > { %p149_p7 = scmp.eq.s32.totalorder %s749_s22, 1  ;;  %p155_p8 = scmp.eq.s32.totalorder %s511_s23, 1 }
   0xd   : > { %p545_p10 = scmp.lt.s32.totalorder %s689_s21, 2  ;;  %s187_s7 = sand.u32 1, %s685_s20  }
   0xe   : > { %p778_p11 = por %p149_p7, %p35_p0  ;;  %p782_p12 = por %p155_p8, %p41_p3 }
   0xf   : > { %s525_s8 = sshll.u32 %s689_s21, 7  ;;  %s514_s9 = sshll.u32 %s187_s7, 3 }
  0x10   : > { %s929_s30 = scalar_select %p778_p11, 1, 0 }
  0x11   : > { %s930_s6 = scalar_select %p782_p12, 1, 0 }
  0x12   : > { %s791_s12 = scalar_lea.hbm %s920_s0, %s525_s8  ;;  %s191_s13 = scalar_lea.vmem [#allocation2], %s514_s9 }
  0x13   : > { %s199_s14 = sshll.u32 %s191_s13, 4  ;;  %p795_p13 = pnand %p545_p10, %p767_p5  ;;  %s799_s14 = int_to_ptr.vmem [resolvable:$true] %s199_s14 }
  0x14   : > { %s188_s16 = scalar_lea.sflag [#allocation3], %s187_s7  ;;  %s593_s17 = scalar_lea.hbm %s791_s12, 128 }
  0x15   : > { %p594_p2 = scmp.ne.s32.totalorder %s791_s12, %s593_s17  ;;  %p595_p3 = pneg %p795_p13 }
  0x16   : > { %s598_s26 = scalar_lea.hbm %s920_s0, 256  ;;  %p599_p5 = scmp.lt.u32.totalorder %s791_s12, %s920_s0 }
  0x17   : > { %p596_p4 = pnand %p595_p3, %p594_p2  ;;  %p600_p8 = scmp.lt.u32.totalorder %s598_s26, %s593_s17 }
  0x18   : > { %p602_p9 = scmp.lt.u32.totalorder %s593_s17, %s791_s12 }
  0x19   : > { %p597_p7 = pneg %p596_p4  ;;  %p601_p10 = por %p600_p8, %p599_p5 }
  0x1b   : > { %p603_p0 = por %p602_p9, %p601_p10 }
  0x1d   : > { %p604_p1 = pnand %p603_p0, %p597_p7 }
  0x1f   : > { %607 = shalt.err (!%p604_p1)
}
  0x20   : > { %s608_s7 = scalar_lea.vmem %s799_s14, 128  ;;  %s691_s9 = smov [#allocation2]  }
  0x21   : > { %p609_p2 = scmp.ne.s32.totalorder %s799_s14, %s608_s7  ;;  %s613_s10 = sshll.u32 %s691_s9, 4  ;;  %s614_s10 = int_to_ptr.vmem [resolvable:$false] %s613_s10 }
  0x22   : > { %s615_s11 = scalar_lea.vmem %s614_s10, 256  ;;  %p616_p11 = scmp.lt.s32.totalorder %s799_s14, %s614_s10 }
  0x23   : > { %p611_p4 = pnand %p609_p2, %p595_p3  ;;  %p617_p5 = scmp.lt.s32.totalorder %s615_s11, %s608_s7 }
  0x25   : > { %p612_p12 = pneg %p611_p4  ;;  %p618_p8 = por %p617_p5, %p616_p11 }
  0x27   : > { %p619_p9 = pnand %p618_p8, %p612_p12 }
  0x29   : > { %622 = shalt.err (!%p619_p9)
}
  0x2a   : > { %540 = dma.hbm_to_vmem [thread:$0]  (!%p795_p13), %s791_s12, 128, %s799_s14, %s188_s16  }
  0x2b   : > { %p932_p0 = scmp.lt.s32.totalorder %s689_s21, 3  ;;  %p933_p1 = scmp.ge.s32.totalorder %s689_s21, 1 }
  0x2d   : > { %p205_p3 = pnand %p933_p1, %p932_p0 }
  0x2e   : > { %s833_s13 = sand.u32 (!%p205_p3), 1, %s681_s19  }
  0x2f   : > { %208 = sbr.rel (%p205_p3) target bundleno = 640 (0x280), region = 40  ;;  %s518_s17 = sshll.u32 (!%p205_p3), %s833_s13, 3 }
  0x30   : > { %s211_s23 = scalar_lea.sflag (!%p205_p3), [#allocation3], %s833_s13  ;;  %s214_s15 = scalar_lea.vmem (!%p205_p3), [#allocation2], %s518_s17 }
  0x36   : > { %668 = dma.done.wait (%p771_p6), %s211_s23, 128  }
  0x37   : > { %670 = vsyncadd (%p771_p6), %s211_s23, 4294967168  ;;  %vm245_vm0 = vcmask 1043456   ;;  %v843_v0 = vld [vmem:[%s214_s15] sm:$0xff]  ;;  %v692_v23 = vmov 1   ;;  %v693_v25 = vmov 0   ;;  %s694_s28 = smov 0.0   ;;  %v292_v28 = vlaneseq }
  0x38   : > { %v243_v1 = vcombine.high %v843_v0, %v843_v0  ;;  %v246_v2 = vsel %vm245_vm0, %v843_v0, 0.0  ;;  %v258_v3 = vmul.f32 %v843_v0, %v843_v0  ;;  %585 = vset.pattern.permute.xlu0 %v692_v23  ;;  %584 = vset.pattern.permute.xlu1 %v693_v25  ;;  %v283_v30 = vld [vmem:[%s921_s1] sm:$0x1]  ;;  %vm305_vm1 = vcmask 27648   ;;  %s427_s10 = scalar_lea.sflag [#allocation4], %s833_s13  ;;  %p934_p11 = scmp.ne.s32.totalorder %s929_s30, 0 }
  0x39   : > { %v293_v29 = vshrl.u32 %v292_v28, 7  ;;  %v286_v35 = vld [vmem:[%s922_s2] sm:$0x1]  ;;  %v695_v44 = vmov 2   ;;  %v696_v45 = vmov 3  }
  0x3a   : > { %v247_v4 = vsel %vm245_vm0, %v243_v1, 0.0  ;;  %v260_v5 = vcombine.high %v258_v3, %v258_v3  ;;  %v262_v6 = vsel %vm245_vm0, %v258_v3, 0.0  ;;  %v290_v36 = vld [vmem:[%s923_s3] sm:$0xf] }
  0x3b   : > { %v248_v7 = vadd.f32 %v247_v4, %v246_v2  ;;  %v294_v31 = vsub.s32 0, %v293_v29  ;;  %v309_v46 = vld [vmem:[%s924_s4] sm:$0xf]  ;;  %v322_v49 = vsub.s32 4, %v293_v29  ;;  %v342_v51 = vsub.s32 1, %v293_v29 }
  0x3c   : > { %v263_v8 = vsel %vm245_vm0, %v260_v5, 0.0  ;;  %v346_v52 = vsub.s32 5, %v293_v29  ;;  %v368_v53 = vsub.s32 2, %v293_v29  ;;  %v372_v54 = vsub.s32 6, %v293_v29 }
  0x3d   : > { %249 = vadd.xlane.f32.xlu0 %v248_v7  ;;  %v264_v9 = vadd.f32 %v263_v8, %v262_v6  ;;  %v319_v55 = vrot.slane %v843_v0, %v294_v31  ;;  %v323_v56 = vrot.slane %v843_v0, %v322_v49  ;;  %v394_v57 = vsub.s32 3, %v293_v29 }
  0x3e   : > { %v398_v58 = vsub.s32 7, %v293_v29  ;;  %v343_v59 = vrot.slane %v843_v0, %v342_v51  ;;  %v347_v60 = vrot.slane %v843_v0, %v346_v52  ;;  %v369_v61 = vrot.slane %v843_v0, %v368_v53 }
  0x3f   : > { %v373_v62 = vrot.slane %v843_v0, %v372_v54  ;;  %v329_v1 = vrot.slane %v319_v55, %v294_v31  ;;  %v333_v2 = vrot.slane %v323_v56, %v294_v31  ;;  %v395_v3 = vrot.slane %v843_v0, %v394_v57 }
  0x40   : > { %v399_v4 = vrot.slane %v843_v0, %v398_v58  ;;  %v353_v5 = vrot.slane %v343_v59, %v342_v51  ;;  %v357_v6 = vrot.slane %v347_v60, %v342_v51  ;;  %v379_v7 = vrot.slane %v369_v61, %v368_v53 }
  0x41   : > { %265 = vadd.xlane.f32.xlu0 %v264_v9  ;;  %v383_v8 = vrot.slane %v373_v62, %v368_v53 }
  0xca   : > { %v250_v10 = vpop.xlane.xlu0 %249 }
  0xcb   : > { %v251_v11 = vrot.slane %v250_v10, 4 }
  0xcd   : > { %v252_v12 = vadd.f32 %v251_v11, %v250_v10 }
  0xce   : > { %v266_v13 = vpop.xlane.xlu0 %265 }
  0xcf   : > { %v253_v14 = vrot.slane %v252_v12, 2  ;;  %v267_v15 = vrot.slane %v266_v13, 4 }
  0xd1   : > { %v268_v16 = vadd.f32 %v267_v15, %v266_v13  ;;  %v254_v17 = vadd.f32 %v253_v14, %v252_v12  ;;  %v405_v12 = vrot.slane %v395_v3, %v394_v57  ;;  %v409_v13 = vrot.slane %v399_v4, %v394_v57 }
  0xd3   : > { %v269_v18 = vrot.slane %v268_v16, 2  ;;  %v255_v19 = vrot.slane %v254_v17, 1 }
  0xd5   : > { %v256_v20 = vadd.f32 %v255_v19, %v254_v17  ;;  %v270_v21 = vadd.f32 %v269_v18, %v268_v16 }
  0xd7   : > { %527 = vpush %v256_v20  ;;  %v271_v22 = vrot.slane %v270_v21, 1 }
  0xd9   : > { %v272_v24 = vadd.f32 %v271_v22, %v270_v21 }
  0xdb   : > { %529 = vpush %v272_v24 }
 0x108   : > { %s528_s29 = spop %527 }
 0x109   : > { %s274_s12 = smul.f32 0.0009765625, %s528_s29 }
 0x10b   : > { %s276_s14 = smul.f32 %s274_s12, %s274_s12  ;;  %v287_v34 = vstv %s274_s12 }
 0x10c   : > { %s530_s16 = spop %529 }
 0x10d   : > { %s275_s25 = smul.f32 0.0009765625, %s530_s16 }
 0x10f   : > { %s277_s26 = ssub.f32 %s275_s25, %s276_s14  ;;  %s526_s25 = sshll.u32 %s749_s22, 7 }
 0x110   : > { %s876_s9 = scalar_lea.hbm %s925_s5, %s526_s25  ;;  %s697_s22 = smov [#allocation5]  }
 0x111   : > { %s278_s8 = smax.f32 %s694_s28, %s277_s26  ;;  %s240_s26 = scalar_lea.vmem [#allocation5], %s518_s17 }
 0x112   : > { %s279_s7 = sadd.f32 1e-05, %s278_s8  ;;  %s441_s28 = sshll.u32 %s240_s26, 4  ;;  %s878_s28 = int_to_ptr.vmem [resolvable:$true] %s441_s28 }
 0x113   : > { %s627_s17 = sshll.u32 %s697_s22, 4  ;;  %s628_s17 = int_to_ptr.vmem [resolvable:$false] %s627_s17 }
 0x114   : > { %v280_v26 = vstv %s279_s7  ;;  %s629_s23 = scalar_lea.vmem %s628_s17, 256  ;;  %p630_p7 = scmp.lt.s32.totalorder %s878_s28, %s628_s17 }
 0x115   : > { %591 = vrsqrt.f32 %v280_v26 }
 0x11f   : > { %v592_v27 = vpop.eup %591 }
 0x120   : > { %531 = vpush %v592_v27 }
 0x151   : > { %s532_s11 = spop %531 }
 0x152   : > { %v284_v32 = vstv %s532_s11  ;;  %s623_s11 = scalar_lea.vmem %s878_s28, 128 }
 0x153   : > { %v285_v33 = vmul.f32 %v284_v32, %v283_v30  ;;  %p624_p6 = scmp.ne.s32.totalorder %s878_s28, %s623_s11  ;;  %p631_p10 = scmp.lt.s32.totalorder %s629_s23, %s623_s11 }
 0x155   : > { %v288_v37 = vmul.f32 %v287_v34, %v285_v33  ;;  %v295_v38 = vrot.slane %v285_v33, %v294_v31  ;;  %p625_p12 = pnand %p624_p6, %p934_p11  ;;  %p632_p2 = por %p631_p10, %p630_p7 }
 0x157   : > { %v289_v39 = vsub.f32 %v286_v35, %v288_v37  ;;  %v297_v40 = vmul.f32 %v295_v38, %v290_v36  ;;  %p626_p13 = pneg %p625_p12 }
 0x159   : > { %337 = vperm.xlu0 %585, %v297_v40   ;;  %v302_v41 = vrot.slane %v289_v39, %v294_v31  ;;  %p633_p4 = pnand %p632_p2, %p626_p13 }
 0x15b   : > { %v304_v42 = vmul.f32 %v302_v41, %v290_v36 }
 0x15d   : > { %v306_v43 = vsel %vm305_vm1, %v304_v42, 0.0  ;;  %589 = vset.pattern.permute.xlu0 %v693_v25 }
 0x15e   : > { %307 = vadd.xlane.f32.xlu1 %v306_v43 }
 0x16f   : > { %313 = vperm.xlu1 %584, %v297_v40  }
 0x173   : > { %586 = vset.pattern.permute.xlu1 %v695_v44 }
 0x174   : > { %363 = vperm.xlu1 %586, %v297_v40  }
 0x178   : > { %587 = vset.pattern.permute.xlu1 %v696_v45 }
 0x179   : > { %389 = vperm.xlu1 %587, %v297_v40  }
 0x17d   : > { %588 = vset.pattern.permute.xlu1 %v693_v25 }
 0x1d8   : > { %v338_v9 = vpop.permute.xlu0 %337 }
 0x1d9   : > { %v358_v15 = vmul.f32 %v353_v5, %v338_v9  ;;  %v359_v16 = vmul.f32 %v357_v6, %v338_v9 }
 0x1eb   : > { %v308_v47 = vpop.xlane.xlu1 %307 }
 0x1ec   : > { %v310_v48 = vadd.f32 %v309_v46, %v308_v47 }
 0x1ee   : > { %416 = vperm.xlu1 %588, %v310_v48  }
 0x1ef   : > { %v314_v50 = vpop.permute.xlu1 %313 }
 0x1f0   : > { %v334_v10 = vmul.f32 %v329_v1, %v314_v50  ;;  %v335_v11 = vmul.f32 %v333_v2, %v314_v50 }
 0x1f2   : > { %v360_v19 = vadd.f32 %v358_v15, %v334_v10  ;;  %v361_v20 = vadd.f32 %v359_v16, %v335_v11 }
 0x1f3   : > { %v364_v63 = vpop.permute.xlu1 %363 }
 0x1f4   : > { %v384_v17 = vmul.f32 %v379_v7, %v364_v63  ;;  %v385_v18 = vmul.f32 %v383_v8, %v364_v63 }
 0x1f6   : > { %v386_v22 = vadd.f32 %v384_v17, %v360_v19  ;;  %v387_v23 = vadd.f32 %v385_v18, %v361_v20 }
 0x1f8   : > { %v390_v14 = vpop.permute.xlu1 %389 }
 0x1f9   : > { %v410_v21 = vmul.f32 %v405_v12, %v390_v14  ;;  %v411_v0 = vmul.f32 %v409_v13, %v390_v14 }
 0x1fb   : > { %v412_v24 = vadd.f32 %v410_v21, %v386_v22  ;;  %v413_v25 = vadd.f32 %v411_v0, %v387_v23 }
 0x26d   : > { %v417_v26 = vpop.permute.xlu1 %416 }
 0x26e   : > { %v419_v27 = vadd.f32 %v417_v26, %v412_v24  ;;  %v420_v28 = vadd.f32 %v417_v26, %v413_v25 }
 0x270   : > { %v423_v29 = vcombine.low %v419_v27, %v420_v28 }
 0x272   : > { %425 = vst [vmem:[%s240_s26] sm:$0xff] %v423_v29 }
 0x273   : > { %636 = shalt.err (!%p633_p4)
}
 0x274   : > { %s637_s13 = scalar_lea.hbm %s876_s9, 128  ;;  %s641_s14 = scalar_lea.hbm %s925_s5, 256 }
 0x275   : > { %p638_p5 = scmp.ne.s32.totalorder %s876_s9, %s637_s13  ;;  %p642_p0 = scmp.lt.u32.totalorder %s876_s9, %s925_s5 }
 0x276   : > { %p643_p1 = scmp.lt.u32.totalorder %s641_s14, %s637_s13  ;;  %p645_p6 = scmp.lt.u32.totalorder %s637_s13, %s876_s9 }
 0x277   : > { %p639_p8 = pnand %p638_p5, %p934_p11 }
 0x278   : > { %p644_p3 = por %p643_p1, %p642_p0 }
 0x279   : > { %p640_p9 = pneg %p639_p8 }
 0x27a   : > { %p646_p12 = por %p645_p6, %p644_p3 }
 0x27c   : > { %p647_p13 = pnand %p646_p12, %p640_p9 }
 0x27e   : > { %650 = shalt.err (!%p647_p13)
}
 0x27f   : > { %535 = dma.vmem_to_hbm [thread:$0]  (%p934_p11), %s878_s28, 128, %s876_s9, %s427_s10  }
 0x280 PF: > { %s453_s25 = sand.u32 1, %s677_s18   ;;  %p935_p7 = scmp.ne.s32.totalorder %s930_s6, 0 }
 0x281   : > { %p936_p10 = scmp.ge.s32.totalorder %s689_s21, 2  ;;  %s454_s26 = scalar_lea.sflag [#allocation4], %s453_s25 }
 0x283   : > { %p542_p2 = pnand %p936_p10, %p935_p7 }
 0x285   : > { %672 = dma.done.wait (!%p542_p2), %s454_s26, 128  }
 0x286   : > { %674 = vsyncadd (!%p542_p2), %s454_s26, 4294967168  ;;  %p18_p4 = scmp.ge.s32.totalorder %s753_s24, 4   ;;  %s937_s18 = smov %s681_s19 }
 0x287   : > { %s938_s19 = smov %s685_s20  ;;  %s939_s20 = smov %s765_s27 }
 0x288   : > { %s940_s21 = smov %s753_s24  ;;  %20 = sbr.rel (!%p18_p4) target bundleno = 5 (0x5), region = 85 }
 0x28f   :  { %459 = vsyncpa [#allocation3], 1 }
 0x290   :  { %461 = vsyncpa [#allocation3 + $0x1], 1 }
 0x291   :  { %462 = vsyncpa [#allocation4], 1 }
 0x292   :  { %464 = vsyncpa [#allocation4 + $0x1], 1 }

</bundles_post_ra>
